<compile_context>
chip_gen: v5e
topology: v5e:2x2
jax: 0.10.0
libtpu: 0.0.40
codegen_flags: <defaults>
</compile_context>

<pallas_src>
import jax
import jax.numpy as jnp
from jax.experimental import pallas as pl
from jax.experimental.pallas import tpu as pltpu


def _mlp_kernel(x_ref, w1_ref, b1_ref, w2_ref, b2_ref, o_ref):
    # x_ref:  (1, CinG, TL)    folded channels on sublanes, spatial on lanes
    # w1_ref: (CmidG, CinG)    b1_ref: (CmidG, 1)  f32
    # w2_ref: (CoutG, CmidG)   b2_ref: (CoutG, 1)  f32
    # o_ref:  (1, CoutG, TL)
    x = x_ref[0]                                                 # (CinG, TL)
    h = jnp.dot(w1_ref[...], x, preferred_element_type=jnp.float32)
    h = jnp.maximum(h + b1_ref[...], 0.0)                        # ReLU (CmidG, TL)
    h = h.astype(x.dtype)                                        # no-op for f32 streams
    y = jnp.dot(w2_ref[...], h, preferred_element_type=jnp.float32)
    y = y + b2_ref[...]                                          # (CoutG, TL)
    o_ref[0] = y.astype(o_ref.dtype)


def mlp_pallas(v, w1, b1, w2, b2, *, spatial_tile_max=32768):
    """1x1x1 Conv3d -> ReLU -> 1x1x1 Conv3d  (forward of the MLP module).

    v:  (N, Cin, D, H, W)
    w1: (Cmid, Cin)   b1: (Cmid,)     (Conv3d weights, 1x1x1 kernel dims squeezed)
    w2: (Cout, Cmid)  b2: (Cout,)
    returns (N, Cout, D, H, W)
    """
    N, Cin, D, H, W = v.shape
    Cmid = w1.shape[0]
    Cout = w2.shape[0]
    L = D * H * W

    # ---- Fold G contiguous spatial chunks into the channel/sublane dim. ----
    G = 1
    for g in (16, 8, 4, 2):
        if L % g == 0 and (L // g) >= 128 and max(Cin, Cmid, Cout) * g <= 512:
            G = g
            break
    Lg = L // G
    CinG, CmidG, CoutG = Cin * G, Cmid * G, Cout * G

    # ---- Lane tile over the folded spatial axis (multiple of 128 or full). ----
    cap = max(128, ((spatial_tile_max // G) // 128) * 128)
    pad = 0
    if Lg <= cap:
        tile_l = Lg                                  # single full-extent tile, no pad
    else:
        tile_l = 0
        t = cap
        while t >= 128:                              # largest mult-of-128 divisor <= cap
            if Lg % t == 0:
                tile_l = t
                break
            t -= 128
        if tile_l == 0:
            # TODO(synk): handle the ragged last tile with an in-kernel masked
            # store instead of this (rare) wrapper-side pad + slice.
            tile_l = cap
            pad = (-Lg) % tile_l

    # v7x megacore: keep >= 2 parallel grid steps when possible.
    if N == 1 and (Lg + pad) // tile_l == 1 and tile_l % 256 == 0:
        tile_l //= 2

    Lg_pad = Lg + pad
    num_tiles = Lg_pad // tile_l

    # Free row-major reshape: (N, Cin, L) -> (N, Cin*G, L/G).  No transpose.
    x = v.reshape(N, CinG, Lg)
    if pad:
        x = jnp.pad(x, ((0, 0), (0, 0), (0, pad)))

    # Block-diagonal weights for the folded layout.
    eye_g = jnp.eye(G, dtype=w1.dtype)
    w1_blk = jnp.kron(w1, eye_g)                                 # (CmidG, CinG)
    w2_blk = jnp.kron(w2, eye_g)                                 # (CoutG, CmidG)
    b1_blk = jnp.repeat(b1.astype(jnp.float32), G).reshape(CmidG, 1)
    b2_blk = jnp.repeat(b2.astype(jnp.float32), G).reshape(CoutG, 1)

    grid = (N, num_tiles)

    itemsize = v.dtype.itemsize
    w_itemsize = w1_blk.dtype.itemsize
    flops = 2 * N * Lg_pad * (CinG * CmidG + CmidG * CoutG)
    bytes_accessed = (
        N * Lg_pad * (CinG + CoutG) * itemsize
        + (w1_blk.size + w2_blk.size) * w_itemsize
        + (b1_blk.size + b2_blk.size) * 4
    )

    # Per-step VMEM footprint: double-buffered x/out tiles + hidden temp + weights.
    vmem_need = (
        2 * (CinG + CoutG) * tile_l * itemsize
        + CmidG * tile_l * 4
        + (w1_blk.size + w2_blk.size) * w_itemsize
        + (b1_blk.size + b2_blk.size) * 4
    )
    compiler_kwargs = dict(dimension_semantics=("parallel", "parallel"))
    if vmem_need > (12 << 20):
        # Would exceed v5e's ~16 MiB scoped default; raise explicitly (still
        # well within v6e's 128 MiB and v7x's 64 MiB physical VMEM).
        compiler_kwargs["vmem_limit_bytes"] = int(min(2 * vmem_need, 56 << 20))

    out = pl.pallas_call(
        _mlp_kernel,
        out_shape=jax.ShapeDtypeStruct((N, CoutG, Lg_pad), v.dtype),
        grid_spec=pltpu.PrefetchScalarGridSpec(
            num_scalar_prefetch=0,
            grid=grid,
            in_specs=[
                pl.BlockSpec((1, CinG, tile_l), lambda n, l: (n, 0, l)),
                pl.BlockSpec((CmidG, CinG), lambda n, l: (0, 0)),
                pl.BlockSpec((CmidG, 1), lambda n, l: (0, 0)),
                pl.BlockSpec((CoutG, CmidG), lambda n, l: (0, 0)),
                pl.BlockSpec((CoutG, 1), lambda n, l: (0, 0)),
            ],
            out_specs=pl.BlockSpec((1, CoutG, tile_l), lambda n, l: (n, 0, l)),
        ),
        compiler_params=pltpu.CompilerParams(**compiler_kwargs),
        cost_estimate=pl.CostEstimate(
            flops=flops, transcendentals=0, bytes_accessed=bytes_accessed
        ),
    )(x, w1_blk, b1_blk, w2_blk, b2_blk)

    if pad:
        out = out[:, :, :Lg]
    # Free reshape back: (N, Cout*G, L/G) -> (N, Cout, L) -> NCDHW.
    return out.reshape(N, Cout, D, H, W)


def mlp_reference(v, w1, b1, w2, b2):
    N, Cin, D, H, W = v.shape
    hp = jax.lax.Precision.HIGHEST
    x = v.reshape(N, Cin, -1)                                    # (N, Cin, L)
    h = jnp.maximum(
        jnp.einsum("mc,ncl->nml", w1, x, precision=hp) + b1[None, :, None], 0.0)
    y = jnp.einsum("om,nml->nol", w2, h, precision=hp) + b2[None, :, None]
    return y.reshape(N, w2.shape[0], D, H, W)


if __name__ == "__main__":
    # Module config: MLP(in_channels=4, out_channels=4, mid_channels=32)
    in_ch, mid_ch, out_ch = 4, 32, 4
    N, D, H, W = 2, 8, 16, 16          # L = 2048 -> folds to (Cin*16, 128)

    key = jax.random.PRNGKey(0)
    kx, k1, k2, k3, k4 = jax.random.split(key, 5)

    v = jax.random.normal(kx, (N, in_ch, D, H, W), dtype=jnp.float32)
    # Conv3d-style parameters (1x1x1 kernels squeezed): weight (out, in), bias (out,)
    w1 = jax.random.normal(k1, (mid_ch, in_ch), dtype=jnp.float32) * 0.1
    b1 = jax.random.normal(k2, (mid_ch,), dtype=jnp.float32) * 0.1
    w2 = jax.random.normal(k3, (out_ch, mid_ch), dtype=jnp.float32) * 0.1
    b2 = jax.random.normal(k4, (out_ch,), dtype=jnp.float32) * 0.1

    out = jax.block_until_ready(mlp_pallas(v, w1, b1, w2, b2))
    ref = mlp_reference(v, w1, b1, w2, b2)

    assert out.shape == (N, out_ch, D, H, W), out.shape
    max_err = float(jnp.max(jnp.abs(out - ref)))
    assert jnp.allclose(out, ref, atol=1e-4, rtol=1e-4), f"mismatch, max_err={max_err}"

    print("KERNEL_OK")
</pallas_src>

<mosaic_0001>
module attributes {stable_mosaic.version = 11 : i64} {
  func.func @_mlp_kernel(%arg0: i32, %arg1: i32, %arg2: memref<1x64x128xf32, #tpu.memory_space<vmem>>, %arg3: memref<512x64xf32, #tpu.memory_space<vmem>>, %arg4: memref<512x1xf32, #tpu.memory_space<vmem>>, %arg5: memref<64x512xf32, #tpu.memory_space<vmem>>, %arg6: memref<64x1xf32, #tpu.memory_space<vmem>>, %arg7: memref<1x64x128xf32, #tpu.memory_space<vmem>>) attributes {dimension_semantics = [#tpu.dimension_semantics<parallel>, #tpu.dimension_semantics<parallel>], iteration_bounds = array<i64: 2, 1>, scalar_prefetch = 0 : i64, scratch_operands = 0 : i64, tpu.core_type = #tpu.core_type<tc>, window_params = [{transform_indices = @transform_0, window_bounds = array<i64: 1, 64, 128>}, {pipeline_mode = #tpu.pipeline_mode<synchronous>, transform_indices = @transform_1, window_bounds = array<i64: 512, 64>}, {pipeline_mode = #tpu.pipeline_mode<synchronous>, transform_indices = @transform_2, window_bounds = array<i64: 512, 1>}, {pipeline_mode = #tpu.pipeline_mode<synchronous>, transform_indices = @transform_3, window_bounds = array<i64: 64, 512>}, {pipeline_mode = #tpu.pipeline_mode<synchronous>, transform_indices = @transform_4, window_bounds = array<i64: 64, 1>}, {transform_indices = @transform_5, window_bounds = array<i64: 1, 64, 128>}]} {
    %c0 = arith.constant 0 : index
    %c0_0 = arith.constant 0 : index
    %c0_1 = arith.constant 0 : index
    %0 = vector.load %arg2[%c0, %c0_0, %c0_1] : memref<1x64x128xf32, #tpu.memory_space<vmem>>, vector<1x64x128xf32>
    %1 = vector.shape_cast %0 : vector<1x64x128xf32> to vector<64x128xf32>
    %c0_2 = arith.constant 0 : index
    %c0_3 = arith.constant 0 : index
    %2 = vector.load %arg3[%c0_2, %c0_3] : memref<512x64xf32, #tpu.memory_space<vmem>>, vector<512x64xf32>
    %cst = arith.constant dense<0.000000e+00> : vector<512x128xf32>
    %3 = tpu.matmul %2, %1, %cst {dimension_numbers = #tpu.dot_dimension_numbers<[1], [0], [0], [1], [0, 0, 1, 1], [], []>} : vector<512x64xf32>, vector<64x128xf32>, vector<512x128xf32> -> vector<512x128xf32>
    %c0_4 = arith.constant 0 : index
    %c0_5 = arith.constant 0 : index
    %4 = vector.load %arg4[%c0_4, %c0_5] : memref<512x1xf32, #tpu.memory_space<vmem>>, vector<512x1xf32>
    %5 = vector.broadcast %4 : vector<512x1xf32> to vector<512x128xf32>
    %6 = arith.addf %3, %5 : vector<512x128xf32>
    %cst_6 = arith.constant 0.000000e+00 : f32
    %7 = vector.broadcast %cst_6 : f32 to vector<512x128xf32>
    %8 = arith.maximumf %6, %7 : vector<512x128xf32>
    %c0_7 = arith.constant 0 : index
    %c0_8 = arith.constant 0 : index
    %9 = vector.load %arg5[%c0_7, %c0_8] : memref<64x512xf32, #tpu.memory_space<vmem>>, vector<64x512xf32>
    %cst_9 = arith.constant dense<0.000000e+00> : vector<64x128xf32>
    %10 = tpu.matmul %9, %8, %cst_9 {dimension_numbers = #tpu.dot_dimension_numbers<[1], [0], [0], [1], [0, 0, 1, 1], [], []>} : vector<64x512xf32>, vector<512x128xf32>, vector<64x128xf32> -> vector<64x128xf32>
    %c0_10 = arith.constant 0 : index
    %c0_11 = arith.constant 0 : index
    %11 = vector.load %arg6[%c0_10, %c0_11] : memref<64x1xf32, #tpu.memory_space<vmem>>, vector<64x1xf32>
    %12 = vector.broadcast %11 : vector<64x1xf32> to vector<64x128xf32>
    %13 = arith.addf %10, %12 : vector<64x128xf32>
    %c0_12 = arith.constant 0 : index
    %c0_13 = arith.constant 0 : index
    %c0_14 = arith.constant 0 : index
    %14 = vector.load %arg7[%c0_12, %c0_13, %c0_14] : memref<1x64x128xf32, #tpu.memory_space<vmem>>, vector<1x64x128xf32>
    %15 = vector.shape_cast %14 : vector<1x64x128xf32> to vector<64x128xf32>
    %16 = vector.shape_cast %13 : vector<64x128xf32> to vector<1x64x128xf32>
    tpu.vector_store %arg7[%c0_12, %c0_13, %c0_14], %16 {strides = array<i32>} : memref<1x64x128xf32, #tpu.memory_space<vmem>>, vector<1x64x128xf32>,
    return
  }
  func.func @transform_0(%arg0: i32, %arg1: i32) -> (i32, i32, i32) {
    %c0_i32 = arith.constant 0 : i32
    %c0_i32_0 = arith.constant 0 : i32
    return %arg0, %c0_i32, %arg1 : i32, i32, i32
  }
  func.func @transform_1(%arg0: i32, %arg1: i32) -> (i32, i32) {
    %c0_i32 = arith.constant 0 : i32
    %c0_i32_0 = arith.constant 0 : i32
    %c0_i32_1 = arith.constant 0 : i32
    return %c0_i32, %c0_i32_0 : i32, i32
  }
  func.func @transform_2(%arg0: i32, %arg1: i32) -> (i32, i32) {
    %c0_i32 = arith.constant 0 : i32
    %c0_i32_0 = arith.constant 0 : i32
    %c0_i32_1 = arith.constant 0 : i32
    return %c0_i32, %c0_i32_0 : i32, i32
  }
  func.func @transform_3(%arg0: i32, %arg1: i32) -> (i32, i32) {
    %c0_i32 = arith.constant 0 : i32
    %c0_i32_0 = arith.constant 0 : i32
    %c0_i32_1 = arith.constant 0 : i32
    return %c0_i32, %c0_i32_0 : i32, i32
  }
  func.func @transform_4(%arg0: i32, %arg1: i32) -> (i32, i32) {
    %c0_i32 = arith.constant 0 : i32
    %c0_i32_0 = arith.constant 0 : i32
    %c0_i32_1 = arith.constant 0 : i32
    return %c0_i32, %c0_i32_0 : i32, i32
  }
  func.func @transform_5(%arg0: i32, %arg1: i32) -> (i32, i32, i32) {
    %c0_i32 = arith.constant 0 : i32
    %c0_i32_0 = arith.constant 0 : i32
    return %arg0, %c0_i32, %arg1 : i32, i32, i32
  }
}

</mosaic_0001>

<bundles_post_ra>
// kernel: tpu_custom_call.1
= control target key start
LH: loop header
LB: loop body
LE: loop exit
PB: predicated region body
PF: predicated region fallthrough
CT: control target
= control target key end

     0   :  { %10 = vsyncpa [#allocation3], 0  ;;  %s2745_s0 = inlined_call_operand.vmem [shape: f32[2,64,128], index: 0, kind: input, shape index: {}]   ;;  %s2746_s1 = inlined_call_operand.vmem [shape: f32[512,64], index: 1, kind: input, shape index: {}]   ;;  %s2747_s2 = inlined_call_operand.vmem [shape: f32[512,1], index: 2, kind: input, shape index: {}]   ;;  %s2748_s3 = inlined_call_operand.vmem [shape: f32[64,512], index: 3, kind: input, shape index: {}]   ;;  %s2749_s4 = inlined_call_operand.vmem [shape: f32[64,1], index: 4, kind: input, shape index: {}]   ;;  %s2750_s5 = inlined_call_operand.hbm [shape: f32[2,64,128], index: 5, kind: output, shape index: {}]  }
   0x1   :  { %12 = vsyncpa [#allocation3 + $0x1], 0  ;;  %s1794_s18 = smov 0   ;;  %s1796_s19 = smov 0  }
   0x2   :  { %s1798_s20 = smov 0   ;;  %s1800_s21 = smov 0  }
   0x3   :  { %s1802_s22 = smov 0   ;;  %s1804_s23 = smov 0  }
   0x4 LB: > { %s1517_s24 = sadd.s32 4294967295, %s1759_s23   ;;  %s1518_s25 = sadd.s32 4294967294, %s1759_s23   ;;  %s1759_s23 = sphi %s1804_s23, %s18_s23   ;;  %s1755_s22 = sphi %s1802_s22, %s2809_s22   ;;  %s1751_s21 = sphi %s1800_s21, %s2808_s21   ;;  %s1747_s20 = sphi %s1798_s20, %s2807_s20   ;;  %s1743_s19 = sphi %s1796_s19, %s2806_s19   ;;  %s1739_s18 = sphi %s1794_s18, %s2805_s18  }
   0x5   : > { %s30_s26 = sadd.s32 1, %s1755_s22  ;;  %s151_s27 = sadd.s32 1, %s1747_s20 }
   0x6   : > { %p32_p0 = scmp.ge.s32.totalorder %s30_s26, 2  ;;  %p161_p1 = scmp.ne.s32.totalorder %s1747_s20, %s1743_s19 }
   0x7   : > { %p162_p2 = scmp.eq.s32.totalorder %s1517_s24, 1  ;;  %p167_p3 = scmp.ne.s32.totalorder %s1743_s19, %s1739_s18 }
   0x8   : > { %s2811_s26 = smov (%p32_p0, %s30_s26), 0  ;;  %p168_p5 = scmp.eq.s32.totalorder %s1518_s25, 1 }
   0x9   : > { %p1834_p4 = por %p162_p2, %p161_p1  ;;  %s146_s29 = ssub.s32 %s1755_s22, %s2811_s26 }
   0xa   : > { %p1521_p6 = scmp.ge.s32.totalorder %s1759_s23, 1  ;;  %p149_p7 = scmp.eq.s32.totalorder %s146_s29, 0 }
   0xb   : > { %p1841_p8 = por %p168_p5, %p167_p3  ;;  %p209_p9 = scmp.lt.s32.totalorder %s1759_s23, 3 }
   0xc   : > { %s1847_s6 = scalar_select %p149_p7, %s1747_s20, %s151_s27  }
   0xd   : > { %p210_p10 = pnand %p1521_p6, %p209_p9 }
   0xf   : > { %213 = sbr.rel (%p210_p10) target bundleno = 581 (0x245), region = 40 }
  0x14   : > { %v324_v0 = vld [vmem:[%s2747_s2 + $0x20] sm:$0xff]  ;;  %v322_v1 = vld [vmem:[%s2747_s2 + $0x10] sm:$0xff]  ;;  %p240_p11 = scmp.lt.s32.totalorder %s1751_s21, 1  ;;  %v1761_v3 = vmov 0   ;;  %v325_v6 = vld [vmem:[%s2747_s2 + $0x28] sm:$0xff]  ;;  %vm704_vm0 = vcmask 523264  }
  0x15   : > { %v320_v2 = vld [vmem:[%s2747_s2] sm:$0xff]  ;;  %1680 = vset.pattern.permute.xlu2 %v1761_v3  ;;  %1679 = vset.pattern.permute.xlu1 %v1761_v3  ;;  %v323_v7 = vld [vmem:[%s2747_s2 + $0x18] sm:$0xff]  ;;  %v321_v8 = vld [vmem:[%s2747_s2 + $0x8] sm:$0xff]  ;;  %s237_s25 = sand.u32 1, %s1743_s19   ;;  %s1701_s16 = scalar_lea.hbm %s2750_s5, 128 }
  0x16   : > { %1678 = vset.pattern.permute.xlu0 %v1761_v3  ;;  %406 = vperm.xlu2 %1680, %v324_v0   ;;  %s241_s13 = scalar_select %p240_p11, %s1751_s21, 1  ;;  %v328_v13 = vld [vmem:[%s2747_s2 + $0x40] sm:$0xff]  ;;  %v327_v14 = vld [vmem:[%s2747_s2 + $0x38] sm:$0xff]  ;;  %v326_v15 = vld [vmem:[%s2747_s2 + $0x30] sm:$0xff] }
  0x17   : > { %396 = vperm.xlu1 %1679, %v322_v1   ;;  %386 = vperm.xlu0 %1678, %v320_v2   ;;  %v256_v18 = vld [vmem:[%s2746_s1] sm:$0xff]  ;;  %v287_v19 = vld [vmem:[%s2746_s1 + $0xf8] sm:$0xff]  ;;  %v330_v22 = vld [vmem:[%s2747_s2 + $0x50] sm:$0xff]  ;;  %s1522_s27 = sshll.u32 %s237_s25, 6 }
  0x18   : > { %s1594_s14 = sshll.u32 %s241_s13, 6  ;;  %v304_v20 = vld [vmem:[%s2746_s1 + $0x180] sm:$0xff]  ;;  %v331_v21 = vld [vmem:[%s2747_s2 + $0x58] sm:$0xff]  ;;  %v329_v23 = vld [vmem:[%s2747_s2 + $0x48] sm:$0xff]  ;;  %s2695_s29 = scalar_lea.vmem [#allocation2], %s1522_s27 }
  0x19   : > { %s1863_s17 = scalar_lea.vmem %s2745_s0, %s1594_s14  ;;  %v257_v24 = vld [vmem:[%s2746_s1 + $0x8] sm:$0xff]  ;;  %v288_v26 = vld [vmem:[%s2746_s1 + $0x100] sm:$0xff]  ;;  %v334_v28 = vld [vmem:[%s2747_s2 + $0x70] sm:$0xff]  ;;  %s1436_s10 = sshll.u32 %s2695_s29, 4  ;;  %s1437_s10 = int_to_ptr.vmem [resolvable:$true] %s1436_s10 }
  0x1a   : > { %v255_v4 = vld [vmem:[%s1863_s17 + $0x38] sm:$0xff]  ;;  %v254_v5 = vld [vmem:[%s1863_s17 + $0x30] sm:$0xff]  ;;  %v253_v9 = vld [vmem:[%s1863_s17 + $0x28] sm:$0xff] }
  0x1b   : > { %905 = vmatpush.msra.mxu0 %v255_v4  ;;  %1597 = vmatpush.msra.mxu2 %v255_v4  ;;  %v252_v10 = vld [vmem:[%s1863_s17 + $0x20] sm:$0xff]  ;;  %v251_v11 = vld [vmem:[%s1863_s17 + $0x18] sm:$0xff]  ;;  %v250_v12 = vld [vmem:[%s1863_s17 + $0x10] sm:$0xff] }
  0x1c   : > { %1598 = vmatpush.msra.mxu3 %v255_v4  ;;  %1596 = vmatpush.msra.mxu1 %v255_v4  ;;  %v249_v16 = vld [vmem:[%s1863_s17 + $0x8] sm:$0xff]  ;;  %v248_v17 = vld [vmem:[%s1863_s17] sm:$0xff]  ;;  %v258_v31 = vld [vmem:[%s2746_s1 + $0x10] sm:$0xff]  ;;  %s1595_s17 = sshll.u32 %s1751_s21, 6  ;;  %s1423_s21 = scalar_lea.sflag [#allocation3], %s237_s25 }
  0x1d   : > { %906 = vmatpush.msra.mxu0 %v254_v5  ;;  %1600 = vmatpush.msra.mxu2 %v254_v5  ;;  %v281_v25 = vld [vmem:[%s2746_s1 + $0xc8] sm:$0xff]  ;;  %v332_v30 = vld [vmem:[%s2747_s2 + $0x60] sm:$0xff]  ;;  %v282_v32 = vld [vmem:[%s2746_s1 + $0xd0] sm:$0xff]  ;;  %s1435_s9 = scalar_lea.hbm %s2750_s5, %s1595_s17 }
  0x1e   : > { %1601 = vmatpush.msra.mxu3 %v254_v5  ;;  %411 = vperm.xlu2 %1680, %v325_v6   ;;  %v305_v27 = vld [vmem:[%s2746_s1 + $0x188] sm:$0xff]  ;;  %v306_v34 = vld [vmem:[%s2746_s1 + $0x190] sm:$0xff]  ;;  %v336_v36 = vld [vmem:[%s2747_s2 + $0x80] sm:$0xff]  ;;  %s1438_s11 = sshll.u32 %s1435_s9, 4  ;;  %s1439_s11 = int_to_ptr.hbm [resolvable:$true] %s1438_s11 }
  0x1f   : > { %401 = vperm.xlu1 %1679, %v323_v7   ;;  %391 = vperm.xlu0 %1678, %v321_v8   ;;  %v333_v29 = vld [vmem:[%s2747_s2 + $0x68] sm:$0xff]  ;;  %v335_v37 = vld [vmem:[%s2747_s2 + $0x78] sm:$0xff]  ;;  %v290_v40 = vld [vmem:[%s2746_s1 + $0x110] sm:$0xff]  ;;  %s1695_s12 = sshra.s32 %s1439_s11, 4  ;;  %s1696_s12 = int_to_ptr.hbm [resolvable:$true] %s1695_s12 }
  0x20   : > { %907 = vmatpush.msra.mxu0 %v253_v9  ;;  %1603 = vmatpush.msra.mxu2 %v253_v9  ;;  %v289_v33 = vld [vmem:[%s2746_s1 + $0x108] sm:$0xff]  ;;  %v259_v38 = vld [vmem:[%s2746_s1 + $0x18] sm:$0xff]  ;;  %v340_v42 = vld [vmem:[%s2747_s2 + $0xa0] sm:$0xff]  ;;  %s1697_s13 = scalar_lea.hbm %s1696_s12, 64  ;;  %p1702_p1 = scmp.lt.s32.totalorder %s1696_s12, %s2750_s5 }
  0x21   : > { %1604 = vmatpush.msra.mxu3 %v253_v9  ;;  %1599 = vmatpush.msra.mxu1 %v254_v5  ;;  %v337_v35 = vld [vmem:[%s2747_s2 + $0x88] sm:$0xff]  ;;  %v283_v39 = vld [vmem:[%s2746_s1 + $0xd8] sm:$0xff]  ;;  %v338_v44 = vld [vmem:[%s2747_s2 + $0x90] sm:$0xff]  ;;  %p1698_p12 = scmp.ne.s32.totalorder %s1696_s12, %s1697_s13  ;;  %p1703_p2 = scmp.lt.s32.totalorder %s1701_s16, %s1697_s13 }
  0x22   : > { %908 = vmatpush.msra.mxu0 %v252_v10  ;;  %1606 = vmatpush.msra.mxu2 %v252_v10  ;;  %v307_v41 = vld [vmem:[%s2746_s1 + $0x198] sm:$0xff]  ;;  %v260_v45 = vld [vmem:[%s2746_s1 + $0x20] sm:$0xff]  ;;  %v342_v50 = vld [vmem:[%s2747_s2 + $0xb0] sm:$0xff] }
  0x23   : > { %1607 = vmatpush.msra.mxu3 %v252_v10  ;;  %1602 = vmatpush.msra.mxu1 %v253_v9  ;;  %v339_v43 = vld [vmem:[%s2747_s2 + $0x98] sm:$0xff]  ;;  %v284_v46 = vld [vmem:[%s2746_s1 + $0xe0] sm:$0xff]  ;;  %v341_v51 = vld [vmem:[%s2747_s2 + $0xa8] sm:$0xff]  ;;  %p1699_p13 = pnand %p1698_p12, %p1834_p4  ;;  %p1704_p3 = por %p1703_p2, %p1702_p1 }
  0x24   : > { %909 = vmatpush.msra.mxu0 %v251_v11  ;;  %1609 = vmatpush.msra.mxu2 %v251_v11  ;;  %v291_v47 = vld [vmem:[%s2746_s1 + $0x118] sm:$0xff]  ;;  %v308_v48 = vld [vmem:[%s2746_s1 + $0x1a0] sm:$0xff]  ;;  %v261_v52 = vld [vmem:[%s2746_s1 + $0x28] sm:$0xff] }
  0x25   : > { %1610 = vmatpush.msra.mxu3 %v251_v11  ;;  %1605 = vmatpush.msra.mxu1 %v252_v10  ;;  %v343_v49 = vld [vmem:[%s2747_s2 + $0xb8] sm:$0xff]  ;;  %v285_v53 = vld [vmem:[%s2746_s1 + $0xe8] sm:$0xff]  ;;  %v292_v54 = vld [vmem:[%s2746_s1 + $0x120] sm:$0xff]  ;;  %p1700_p0 = pneg %p1699_p13 }
  0x26   : > { %910 = vmatpush.msra.mxu0 %v250_v12  ;;  %1612 = vmatpush.msra.mxu2 %v250_v12  ;;  %v309_v55 = vld [vmem:[%s2746_s1 + $0x1a8] sm:$0xff]  ;;  %v346_v56 = vld [vmem:[%s2747_s2 + $0xd0] sm:$0xff]  ;;  %v344_v58 = vld [vmem:[%s2747_s2 + $0xc0] sm:$0xff] }
  0x27   : > { %1613 = vmatpush.msra.mxu3 %v250_v12  ;;  %426 = vperm.xlu2 %1680, %v328_v13   ;;  %v345_v57 = vld [vmem:[%s2747_s2 + $0xc8] sm:$0xff]  ;;  %v262_v59 = vld [vmem:[%s2746_s1 + $0x30] sm:$0xff]  ;;  %v351_v0 = vld [vmem:[%s2747_s2 + $0xf8] sm:$0xff]  ;;  %p1705_p5 = pnand %p1704_p3, %p1700_p0 }
  0x28   : > { %421 = vperm.xlu1 %1679, %v327_v14   ;;  %416 = vperm.xlu0 %1678, %v326_v15   ;;  %v286_v60 = vld [vmem:[%s2746_s1 + $0xf0] sm:$0xff]  ;;  %v293_v61 = vld [vmem:[%s2746_s1 + $0x128] sm:$0xff]  ;;  %v347_v1 = vld [vmem:[%s2747_s2 + $0xd8] sm:$0xff] }
  0x29   : > { %911 = vmatpush.msra.mxu0 %v249_v16  ;;  %1615 = vmatpush.msra.mxu2 %v249_v16  ;;  %v310_v62 = vld [vmem:[%s2746_s1 + $0x1b0] sm:$0xff]  ;;  %v263_v2 = vld [vmem:[%s2746_s1 + $0x38] sm:$0xff]  ;;  %v349_v6 = vld [vmem:[%s2747_s2 + $0xe8] sm:$0xff] }
  0x2a   : > { %1616 = vmatpush.msra.mxu3 %v249_v16  ;;  %1608 = vmatpush.msra.mxu1 %v251_v11  ;;  %v350_v63 = vld [vmem:[%s2747_s2 + $0xf0] sm:$0xff]  ;;  %v311_v4 = vld [vmem:[%s2746_s1 + $0x1b8] sm:$0xff]  ;;  %v264_v8 = vld [vmem:[%s2746_s1 + $0x40] sm:$0xff] }
  0x2b   : > { %912 = vmatpush.msra.mxu0 %v248_v17  ;;  %1618 = vmatpush.msra.mxu2 %v248_v17  ;;  %v294_v3 = vld [vmem:[%s2746_s1 + $0x130] sm:$0xff]  ;;  %v367_v7 = vld [vmem:[%s2747_s2 + $0x178] sm:$0xff]  ;;  %v312_v10 = vld [vmem:[%s2746_s1 + $0x1c0] sm:$0xff] }
  0x2c   : > { %1619 = vmatpush.msra.mxu3 %v248_v17  ;;  %1525 = vmatmul.msk.f32.vlgmr.msra.gmra.mxu0 %vm704_vm0, %v256_v18  ;;  %v366_v5 = vld [vmem:[%s2747_s2 + $0x170] sm:$0xff]  ;;  %v295_v9 = vld [vmem:[%s2746_s1 + $0x138] sm:$0xff]  ;;  %v364_v11 = vld [vmem:[%s2747_s2 + $0x160] sm:$0xff] }
  0x2d   : > { %1556 = vmatmul.msk.f32.vlgmr.msra.gmra.mxu2 %vm704_vm0, %v287_v19  ;;  %1573 = vmatmul.msk.f32.vlgmr.msra.gmra.mxu3 %vm704_vm0, %v304_v20  ;;  %v348_v13 = vld [vmem:[%s2747_s2 + $0xe0] sm:$0xff]  ;;  %v265_v14 = vld [vmem:[%s2746_s1 + $0x48] sm:$0xff]  ;;  %v383_v18 = vld [vmem:[%s2747_s2 + $0x1f8] sm:$0xff] }
  0x2e   : > { %1611 = vmatpush.msra.mxu1 %v250_v12  ;;  %v365_v12 = vld [vmem:[%s2747_s2 + $0x168] sm:$0xff]  ;;  %v296_v15 = vld [vmem:[%s2746_s1 + $0x140] sm:$0xff]  ;;  %v363_v19 = vld [vmem:[%s2747_s2 + $0x158] sm:$0xff] }
  0x2f   : > { %441 = vperm.xlu2 %1680, %v331_v21   ;;  %v266_v20 = vld [vmem:[%s2746_s1 + $0x50] sm:$0xff]  ;;  %v297_v21 = vld [vmem:[%s2746_s1 + $0x148] sm:$0xff] }
  0x30   : > { %436 = vperm.xlu1 %1679, %v330_v22   ;;  %431 = vperm.xlu0 %1678, %v329_v23   ;;  %v314_v22 = vld [vmem:[%s2746_s1 + $0x1d0] sm:$0xff]  ;;  %v381_v23 = vld [vmem:[%s2747_s2 + $0x1e8] sm:$0xff] }
  0x31   : > { %1614 = vmatpush.msra.mxu1 %v249_v16  ;;  %v313_v16 = vld [vmem:[%s2746_s1 + $0x1c8] sm:$0xff] }
  0x33   : > { %1617 = vmatpush.msra.mxu1 %v248_v17  ;;  %v362_v17 = vld [vmem:[%s2747_s2 + $0x150] sm:$0xff] }
  0x34   : > { %1526 = vmatmul.msk.f32.gmra.mxu0 %vm704_vm0, %v257_v24  ;;  %1550 = vmatmul.msk.f32.vlgmr.msra.gmra.mxu1 %vm704_vm0, %v281_v25  ;;  %v361_v24 = vld [vmem:[%s2747_s2 + $0x148] sm:$0xff]  ;;  %v382_v25 = vld [vmem:[%s2747_s2 + $0x1f0] sm:$0xff] }
  0x35   : > { %1557 = vmatmul.msk.f32.gmra.mxu2 %vm704_vm0, %v288_v26  ;;  %1574 = vmatmul.msk.f32.gmra.mxu3 %vm704_vm0, %v305_v27  ;;  %v267_v27 = vld [vmem:[%s2746_s1 + $0x58] sm:$0xff] }
  0x37   : > { %456 = vperm.xlu2 %1680, %v334_v28   ;;  %v298_v28 = vld [vmem:[%s2746_s1 + $0x150] sm:$0xff] }
  0x38   : > { %451 = vperm.xlu1 %1679, %v333_v29   ;;  %446 = vperm.xlu0 %1678, %v332_v30   ;;  %v315_v29 = vld [vmem:[%s2746_s1 + $0x1d8] sm:$0xff] }
  0x39   : > { %v359_v30 = vld [vmem:[%s2747_s2 + $0x138] sm:$0xff] }
  0x3c   : > { %1527 = vmatmul.msk.f32.gmra.mxu0 %vm704_vm0, %v258_v31  ;;  %1551 = vmatmul.msk.f32.gmra.mxu1 %vm704_vm0, %v282_v32  ;;  %v380_v31 = vld [vmem:[%s2747_s2 + $0x1e0] sm:$0xff] }
  0x3d   : > { %1558 = vmatmul.msk.f32.gmra.mxu2 %vm704_vm0, %v289_v33  ;;  %1575 = vmatmul.msk.f32.gmra.mxu3 %vm704_vm0, %v306_v34  ;;  %v360_v32 = vld [vmem:[%s2747_s2 + $0x140] sm:$0xff] }
  0x3e   : > { %v268_v34 = vld [vmem:[%s2746_s1 + $0x60] sm:$0xff] }
  0x3f   : > { %471 = vperm.xlu2 %1680, %v337_v35  }
  0x40   : > { %466 = vperm.xlu1 %1679, %v336_v36   ;;  %461 = vperm.xlu0 %1678, %v335_v37   ;;  %v299_v36 = vld [vmem:[%s2746_s1 + $0x158] sm:$0xff]  ;;  %v316_v37 = vld [vmem:[%s2746_s1 + $0x1e0] sm:$0xff] }
  0x44   : > { %1528 = vmatmul.msk.f32.gmra.mxu0 %vm704_vm0, %v259_v38  ;;  %1552 = vmatmul.msk.f32.gmra.mxu1 %vm704_vm0, %v283_v39  ;;  %v378_v39 = vld [vmem:[%s2747_s2 + $0x1d0] sm:$0xff] }
  0x45   : > { %1559 = vmatmul.msk.f32.gmra.mxu2 %vm704_vm0, %v290_v40  ;;  %1576 = vmatmul.msk.f32.gmra.mxu3 %vm704_vm0, %v307_v41  ;;  %v358_v40 = vld [vmem:[%s2747_s2 + $0x130] sm:$0xff]  ;;  %v379_v41 = vld [vmem:[%s2747_s2 + $0x1d8] sm:$0xff] }
  0x47   : > { %486 = vperm.xlu2 %1680, %v340_v42  }
  0x48   : > { %481 = vperm.xlu1 %1679, %v339_v43   ;;  %476 = vperm.xlu0 %1678, %v338_v44   ;;  %v269_v43 = vld [vmem:[%s2746_s1 + $0x68] sm:$0xff] }
  0x4c   : > { %1529 = vmatmul.msk.f32.gmra.mxu0 %vm704_vm0, %v260_v45  ;;  %1553 = vmatmul.msk.f32.gmra.mxu1 %vm704_vm0, %v284_v46  ;;  %v300_v45 = vld [vmem:[%s2746_s1 + $0x160] sm:$0xff]  ;;  %v317_v46 = vld [vmem:[%s2746_s1 + $0x1e8] sm:$0xff] }
  0x4d   : > { %1560 = vmatmul.msk.f32.gmra.mxu2 %vm704_vm0, %v291_v47  ;;  %1577 = vmatmul.msk.f32.gmra.mxu3 %vm704_vm0, %v308_v48  ;;  %v356_v47 = vld [vmem:[%s2747_s2 + $0x120] sm:$0xff] }
  0x4f   : > { %501 = vperm.xlu2 %1680, %v343_v49   ;;  %v377_v49 = vld [vmem:[%s2747_s2 + $0x1c8] sm:$0xff] }
  0x50   : > { %496 = vperm.xlu1 %1679, %v342_v50   ;;  %491 = vperm.xlu0 %1678, %v341_v51   ;;  %v357_v50 = vld [vmem:[%s2747_s2 + $0x128] sm:$0xff]  ;;  %v270_v51 = vld [vmem:[%s2746_s1 + $0x70] sm:$0xff] }
  0x54   : > { %1530 = vmatmul.msk.f32.gmra.mxu0 %vm704_vm0, %v261_v52  ;;  %1554 = vmatmul.msk.f32.gmra.mxu1 %vm704_vm0, %v285_v53 }
  0x55   : > { %1561 = vmatmul.msk.f32.gmra.mxu2 %vm704_vm0, %v292_v54  ;;  %1578 = vmatmul.msk.f32.gmra.mxu3 %vm704_vm0, %v309_v55  ;;  %v301_v54 = vld [vmem:[%s2746_s1 + $0x168] sm:$0xff]  ;;  %v318_v55 = vld [vmem:[%s2746_s1 + $0x1f0] sm:$0xff] }
  0x57   : > { %516 = vperm.xlu2 %1680, %v346_v56   ;;  %v375_v56 = vld [vmem:[%s2747_s2 + $0x1b8] sm:$0xff] }
  0x58   : > { %511 = vperm.xlu1 %1679, %v345_v57   ;;  %506 = vperm.xlu0 %1678, %v344_v58   ;;  %v355_v57 = vld [vmem:[%s2747_s2 + $0x118] sm:$0xff]  ;;  %v376_v58 = vld [vmem:[%s2747_s2 + $0x1c0] sm:$0xff] }
  0x5c   : > { %1531 = vmatmul.msk.f32.gmra.mxu0 %vm704_vm0, %v262_v59  ;;  %1555 = vmatmul.msk.f32.gmra.mxu1 %vm704_vm0, %v286_v60  ;;  %v271_v60 = vld [vmem:[%s2746_s1 + $0x78] sm:$0xff] }
  0x5d   : > { %1562 = vmatmul.msk.f32.gmra.mxu2 %vm704_vm0, %v293_v61  ;;  %1579 = vmatmul.msk.f32.gmra.mxu3 %vm704_vm0, %v310_v62 }
  0x5f   : > { %536 = vperm.xlu2 %1680, %v350_v63   ;;  %v302_v63 = vld [vmem:[%s2746_s1 + $0x170] sm:$0xff] }
  0x60   : > { %541 = vperm.xlu1 %1679, %v351_v0   ;;  %521 = vperm.xlu0 %1678, %v347_v1   ;;  %v319_v0 = vld [vmem:[%s2746_s1 + $0x1f8] sm:$0xff]  ;;  %v353_v1 = vld [vmem:[%s2747_s2 + $0x108] sm:$0xff] }
  0x64   : > { %1532 = vmatmul.msk.f32.gmra.mxu0 %vm704_vm0, %v263_v2  ;;  %v374_v2 = vld [vmem:[%s2747_s2 + $0x1b0] sm:$0xff] }
  0x65   : > { %1563 = vmatmul.msk.f32.gmra.mxu2 %vm704_vm0, %v294_v3  ;;  %1580 = vmatmul.msk.f32.gmra.mxu3 %vm704_vm0, %v311_v4  ;;  %v354_v3 = vld [vmem:[%s2747_s2 + $0x110] sm:$0xff] }
  0x67   : > { %616 = vperm.xlu2 %1680, %v366_v5  }
  0x68   : > { %531 = vperm.xlu1 %1679, %v349_v6   ;;  %621 = vperm.xlu0 %1678, %v367_v7   ;;  %v272_v6 = vld [vmem:[%s2746_s1 + $0x80] sm:$0xff] }
  0x6c   : > { %1533 = vmatmul.msk.f32.gmra.mxu0 %vm704_vm0, %v264_v8 }
  0x6d   : > { %1564 = vmatmul.msk.f32.gmra.mxu2 %vm704_vm0, %v295_v9  ;;  %1581 = vmatmul.msk.f32.gmra.mxu3 %vm704_vm0, %v312_v10  ;;  %v303_v9 = vld [vmem:[%s2746_s1 + $0x178] sm:$0xff]  ;;  %v372_v10 = vld [vmem:[%s2747_s2 + $0x1a0] sm:$0xff] }
  0x6f   : > { %606 = vperm.xlu2 %1680, %v364_v11   ;;  %v352_v11 = vld [vmem:[%s2747_s2 + $0x100] sm:$0xff] }
  0x70   : > { %611 = vperm.xlu1 %1679, %v365_v12   ;;  %526 = vperm.xlu0 %1678, %v348_v13   ;;  %v2146_v26 = vpop.permute.xlu2 %406  ;;  %v373_v12 = vld [vmem:[%s2747_s2 + $0x1a8] sm:$0xff] }
  0x74   : > { %1534 = vmatmul.msk.f32.gmra.mxu0 %vm704_vm0, %v265_v14 }
  0x75   : > { %1565 = vmatmul.msk.f32.gmra.mxu2 %vm704_vm0, %v296_v15  ;;  %1582 = vmatmul.msk.f32.gmra.mxu3 %vm704_vm0, %v313_v16  ;;  %v273_v16 = vld [vmem:[%s2746_s1 + $0x88] sm:$0xff] }
  0x77   : > { %596 = vperm.xlu2 %1680, %v362_v17  }
  0x78   : > { %701 = vperm.xlu1 %1679, %v383_v18   ;;  %601 = vperm.xlu0 %1678, %v363_v19   ;;  %v2182_v38 = vpop.permute.xlu2 %411 }
  0x7c   : > { %1535 = vmatmul.msk.f32.gmra.mxu0 %vm704_vm0, %v266_v20 }
  0x7d   : > { %1566 = vmatmul.msk.f32.gmra.mxu2 %vm704_vm0, %v297_v21  ;;  %1583 = vmatmul.msk.f32.gmra.mxu3 %vm704_vm0, %v314_v22  ;;  %v369_v22 = vld [vmem:[%s2747_s2 + $0x188] sm:$0xff] }
  0x7f   : > { %691 = vperm.xlu2 %1680, %v381_v23   ;;  %v370_v23 = vld [vmem:[%s2747_s2 + $0x190] sm:$0xff] }
  0x80   : > { %591 = vperm.xlu1 %1679, %v361_v24   ;;  %696 = vperm.xlu0 %1678, %v382_v25   ;;  %v371_v24 = vld [vmem:[%s2747_s2 + $0x198] sm:$0xff] }
  0x81   : > { %v2211_v48 = vpop.permute.xlu2 %426 }
  0x84   : > { %1536 = vmatmul.msk.f32.gmra.mxu0 %vm704_vm0, %v267_v27 }
  0x85   : > { %1567 = vmatmul.msk.f32.gmra.mxu2 %vm704_vm0, %v298_v28  ;;  %1584 = vmatmul.msk.f32.gmra.mxu3 %vm704_vm0, %v315_v29  ;;  %v274_v29 = vld [vmem:[%s2746_s1 + $0x90] sm:$0xff] }
  0x87   : > { %581 = vperm.xlu2 %1680, %v359_v30  }
  0x88   : > { %686 = vperm.xlu1 %1679, %v380_v31   ;;  %586 = vperm.xlu0 %1678, %v360_v32  }
  0x89   : > { %v2169_v33 = vpop.permute.xlu1 %396  ;;  %v2174_v35 = vpop.permute.xlu0 %386 }
  0x8a   : > { %v2246_v59 = vpop.permute.xlu2 %441 }
  0x8c   : > { %1537 = vmatmul.msk.f32.gmra.mxu0 %vm704_vm0, %v268_v34 }
  0x8d   : > { %1568 = vmatmul.msk.f32.gmra.mxu2 %vm704_vm0, %v299_v36  ;;  %1585 = vmatmul.msk.f32.gmra.mxu3 %vm704_vm0, %v316_v37  ;;  %v1203_v36 = vld [vmem:[%s2749_s4 + $0x8] sm:$0xff] }
  0x8f   : > { %676 = vperm.xlu2 %1680, %v378_v39   ;;  %v1202_v39 = vld [vmem:[%s2749_s4] sm:$0xff] }
  0x90   : > { %576 = vperm.xlu1 %1679, %v358_v40   ;;  %681 = vperm.xlu0 %1678, %v379_v41  }
  0x91   : > { %v2196_v42 = vpop.permute.xlu1 %401  ;;  %v392_v44 = vpop.permute.xlu0 %391 }
  0x92   : > { %v2273_v4 = vpop.permute.xlu2 %456 }
  0x94   : > { %1538 = vmatmul.msk.f32.gmra.mxu0 %vm704_vm0, %v269_v43 }
  0x95   : > { %1569 = vmatmul.msk.f32.gmra.mxu2 %vm704_vm0, %v300_v45  ;;  %1586 = vmatmul.msk.f32.gmra.mxu3 %vm704_vm0, %v317_v46 }
  0x97   : > { %566 = vperm.xlu2 %1680, %v356_v47  }
  0x98   : > { %671 = vperm.xlu1 %1679, %v377_v49   ;;  %571 = vperm.xlu0 %1678, %v357_v50   ;;  %v1206_v50 = vld [vmem:[%s2749_s4 + $0x20] sm:$0xff] }
  0x9a   : > { %v2224_v52 = vpop.permute.xlu1 %421  ;;  %v2226_v53 = vpop.permute.xlu0 %416 }
  0x9b   : > { %v2311_v20 = vpop.permute.xlu2 %471 }
  0x9c   : > { %1539 = vmatmul.msk.f32.gmra.mxu0 %vm704_vm0, %v270_v51  ;;  %2755 = vst [vmem:[#allocation7_spill] sm:$0xff] %v2311_v20  ;;  %v1205_v51 = vld [vmem:[%s2749_s4 + $0x18] sm:$0xff] }
  0x9d   : > { %1570 = vmatmul.msk.f32.gmra.mxu2 %vm704_vm0, %v301_v54  ;;  %1587 = vmatmul.msk.f32.gmra.mxu3 %vm704_vm0, %v318_v55 }
  0x9f   : > { %661 = vperm.xlu2 %1680, %v375_v56  }
  0xa0   : > { %561 = vperm.xlu1 %1679, %v355_v57   ;;  %666 = vperm.xlu0 %1678, %v376_v58   ;;  %v276_v58 = vld [vmem:[%s2746_s1 + $0xa0] sm:$0xff] }
  0xa2   : > { %v2251_v61 = vpop.permute.xlu1 %436  ;;  %v2253_v62 = vpop.permute.xlu0 %431 }
  0xa3   : > { %v2345_v37 = vpop.permute.xlu2 %486 }
  0xa4   : > { %1540 = vmatmul.msk.f32.gmra.mxu0 %vm704_vm0, %v271_v60  ;;  %2760 = vst [vmem:[#allocation12_spill] sm:$0xff] %v2345_v37 }
  0xa5   : > { %1571 = vmatmul.msk.f32.gmra.mxu2 %vm704_vm0, %v302_v63  ;;  %1588 = vmatmul.msk.f32.gmra.mxu3 %vm704_vm0, %v319_v0 }
  0xa7   : > { %551 = vperm.xlu2 %1680, %v353_v1   ;;  %v1209_v1 = vld [vmem:[%s2749_s4 + $0x38] sm:$0xff] }
  0xa8   : > { %656 = vperm.xlu1 %1679, %v374_v2   ;;  %556 = vperm.xlu0 %1678, %v354_v3   ;;  %v1208_v2 = vld [vmem:[%s2749_s4 + $0x30] sm:$0xff]  ;;  %v1207_v3 = vld [vmem:[%s2749_s4 + $0x28] sm:$0xff] }
  0xa9   : > { %v2275_v5 = vpop.f32.mrf.mxu0 }
  0xaa   : > { %v2280_v7 = vpop.permute.xlu1 %451  ;;  %v2282_v8 = vpop.permute.xlu0 %446 }
  0xab   : > { %v2377_v54 = vpop.permute.xlu2 %501 }
  0xac   : > { %1541 = vmatmul.msk.f32.gmra.mxu0 %vm704_vm0, %v272_v6  ;;  %2765 = vst [vmem:[#allocation17_spill] sm:$0xff] %v2377_v54 }
  0xad   : > { %1572 = vmatmul.msk.f32.gmra.mxu2 %vm704_vm0, %v303_v9 }
  0xaf   : > { %646 = vperm.xlu2 %1680, %v372_v10  }
  0xb0   : > { %v2298_v13 = vpop.f32.mrf.mxu2  ;;  %v2300_v14 = vpop.f32.mrf.mxu3  ;;  %546 = vperm.xlu1 %1679, %v352_v11   ;;  %651 = vperm.xlu0 %1678, %v373_v12   ;;  %v277_v12 = vld [vmem:[%s2746_s1 + $0xa8] sm:$0xff] }
  0xb1   : > { %2753 = vst [vmem:[#allocation5_spill] sm:$0xff] %v2300_v14  ;;  %v917_v15 = vpop.f32.mrf.mxu0  ;;  %v2313_v21 = vpop.f32.mrf.mxu1 }
  0xb2   : > { %v2305_v17 = vadd.f32 %v917_v15, %v392_v44  ;;  %v2307_v18 = vpop.permute.xlu1 %466  ;;  %v2309_v19 = vpop.permute.xlu0 %461  ;;  %v275_v44 = vld [vmem:[%s2746_s1 + $0x98] sm:$0xff] }
  0xb3   : > { %2754 = vst [vmem:[#allocation6_spill] sm:$0xff] %v2307_v18  ;;  %v517_v10 = vpop.permute.xlu2 %516 }
  0xb4   : > { %1542 = vmatmul.msk.f32.gmra.mxu0 %vm704_vm0, %v273_v16 }
  0xb7   : > { %631 = vperm.xlu2 %1680, %v369_v22  }
  0xb8   : > { %v2325_v25 = vpop.f32.mrf.mxu2  ;;  %v2327_v27 = vpop.f32.mrf.mxu3  ;;  %636 = vperm.xlu1 %1679, %v370_v23   ;;  %641 = vperm.xlu0 %1678, %v371_v24  }
  0xb9   : > { %2756 = vst [vmem:[#allocation8_spill] sm:$0xff] %v2325_v25  ;;  %v920_v28 = vpop.f32.mrf.mxu0  ;;  %v2339_v34 = vpop.f32.mrf.mxu1 }
  0xba   : > { %2757 = vst [vmem:[#allocation9_spill] sm:$0xff] %v2327_v27  ;;  %v2333_v30 = vadd.f32 %v920_v28, %v2169_v33  ;;  %v2335_v31 = vpop.permute.xlu1 %481  ;;  %v2337_v32 = vpop.permute.xlu0 %476  ;;  %v368_v33 = vld [vmem:[%s2747_s2 + $0x180] sm:$0xff] }
  0xbb   : > { %2758 = vst [vmem:[#allocation10_spill] sm:$0xff] %v2335_v31 }
  0xbc   : > { %2759 = vst [vmem:[#allocation11_spill] sm:$0xff] %v2337_v32  ;;  %1543 = vmatmul.msk.f32.gmra.mxu0 %vm704_vm0, %v274_v29 }
  0xbf   : > { %1217 = vperm.xlu2 %1680, %v1203_v36  }
  0xc0   : > { %v2353_v40 = vpop.f32.mrf.mxu2  ;;  %v2355_v41 = vpop.f32.mrf.mxu3  ;;  %1212 = vperm.xlu1 %1679, %v1202_v39   ;;  %626 = vperm.xlu0 %1678, %v368_v33   ;;  %v278_v39 = vld [vmem:[%s2746_s1 + $0xb0] sm:$0xff] }
  0xc1   : > { %2761 = vst [vmem:[#allocation13_spill] sm:$0xff] %v2353_v40  ;;  %v923_v43 = vpop.f32.mrf.mxu0  ;;  %v995_v49 = vpop.f32.mrf.mxu1 }
  0xc2   : > { %2762 = vst [vmem:[#allocation14_spill] sm:$0xff] %v2355_v41  ;;  %v2361_v45 = vadd.f32 %v923_v43, %v2196_v42  ;;  %v2363_v46 = vpop.permute.xlu1 %496  ;;  %v2365_v47 = vpop.permute.xlu0 %491  ;;  %v1204_v42 = vld [vmem:[%s2749_s4 + $0x10] sm:$0xff] }
  0xc3   : > { %2763 = vst [vmem:[#allocation15_spill] sm:$0xff] %v2363_v46 }
  0xc4   : > { %2764 = vst [vmem:[#allocation16_spill] sm:$0xff] %v2365_v47  ;;  %1544 = vmatmul.msk.f32.gmra.mxu0 %vm704_vm0, %v275_v44 }
  0xc7   : > { %1232 = vperm.xlu2 %1680, %v1206_v50  }
  0xc8   : > { %v2379_v55 = vpop.f32.mrf.mxu2  ;;  %v2381_v56 = vpop.f32.mrf.mxu3  ;;  %1227 = vperm.xlu1 %1679, %v1205_v51   ;;  %1222 = vperm.xlu0 %1678, %v1204_v42  }
  0xc9   : > { %2766 = vst [vmem:[#allocation18_spill] sm:$0xff] %v2379_v55  ;;  %v2383_v57 = vpop.f32.mrf.mxu0  ;;  %v998_v0 = vpop.f32.mrf.mxu1 }
  0xca   : > { %2767 = vst [vmem:[#allocation19_spill] sm:$0xff] %v2381_v56  ;;  %v512_v60 = vpop.permute.xlu1 %511  ;;  %v2388_v63 = vpop.permute.xlu0 %506 }
  0xcb   : > { %2768 = vst [vmem:[#allocation20_spill] sm:$0xff] %v2388_v63 }
  0xcc   : > { %1545 = vmatmul.msk.f32.gmra.mxu0 %vm704_vm0, %v276_v58 }
  0xcf   : > { %1247 = vperm.xlu2 %1680, %v1209_v1  }
  0xd0   : > { %v2400_v6 = vpop.f32.mrf.mxu2  ;;  %v2402_v9 = vpop.f32.mrf.mxu3  ;;  %1242 = vperm.xlu1 %1679, %v1208_v2   ;;  %1237 = vperm.xlu0 %1678, %v1207_v3  }
  0xd1   : > { %2769 = vst [vmem:[#allocation21_spill] sm:$0xff] %v2400_v6  ;;  %v2404_v11 = vpop.f32.mrf.mxu0  ;;  %v1001_v23 = vpop.f32.mrf.mxu1 }
  0xd2   : > { %2770 = vst [vmem:[#allocation22_spill] sm:$0xff] %v2402_v9  ;;  %v542_v15 = vpop.permute.xlu1 %541  ;;  %v522_v16 = vpop.permute.xlu0 %521 }
  0xd3   : > { %v1008_v22 = vadd.f32 %v2298_v13, %v542_v15  ;;  %v537_v13 = vpop.permute.xlu2 %536 }
  0xd4   : > { %1546 = vmatmul.msk.f32.gmra.mxu0 %vm704_vm0, %v277_v12 }
  0xd5   : > { %v1137_v24 = vmax.f32 %v1008_v22, 0.0  ;;  %v996_v22 = vadd.f32 %v995_v49, %v522_v16  ;;  %v280_v49 = vld [vmem:[%s2746_s1 + $0xc0] sm:$0xff] }
  0xd7   : > { %1291 = vmatpush.msrb.mxu2 %v1137_v24 }
  0xd8   : > { %v2411_v28 = vpop.f32.mrf.mxu2  ;;  %v2413_v29 = vpop.f32.mrf.mxu3 }
  0xd9   : > { %2771 = vst [vmem:[#allocation23_spill] sm:$0xff] %v2413_v29  ;;  %v932_v36 = vpop.f32.mrf.mxu0  ;;  %v1004_v51 = vpop.f32.mrf.mxu1 }
  0xda   : > { %v2419_v33 = vadd.f32 %v932_v36, %v2226_v53  ;;  %v532_v43 = vpop.permute.xlu1 %531  ;;  %v2421_v44 = vpop.permute.xlu0 %621  ;;  %v1005_v42 = vadd.f32 %v1004_v51, %v537_v13  ;;  %v279_v53 = vld [vmem:[%s2746_s1 + $0xb8] sm:$0xff]  ;;  %v993_v36 = vadd.f32 %v2339_v34, %v517_v10  ;;  %v1133_v13 = vmax.f32 %v996_v22, 0.0 }
  0xdb   : > { %v1002_v50 = vadd.f32 %v1001_v23, %v532_v43  ;;  %v990_v43 = vadd.f32 %v2313_v21, %v512_v60  ;;  %v617_v10 = vpop.permute.xlu2 %616 }
  0xdc   : > { %1547 = vmatmul.msk.f32.gmra.mxu0 %vm704_vm0, %v278_v39  ;;  %v1136_v1 = vmax.f32 %v1005_v42, 0.0  ;;  %v1132_v51 = vmax.f32 %v993_v36, 0.0 }
  0xdd   : > { %v1135_v58 = vmax.f32 %v1002_v50, 0.0 }
  0xde   : > { %1292 = vmatpush.msrb.mxu2 %v1136_v1 }
  0xe0   : > { %v2424_v2 = vpop.f32.mrf.mxu2  ;;  %1293 = vmatpush.msrb.mxu2 %v1135_v58  ;;  %v2432_v23 = vpop.f32.mrf.mxu3 }
  0xe1   : > { %v935_v3 = vpop.f32.mrf.mxu0  ;;  %2772 = vst [vmem:[#allocation24_spill] sm:$0xff] %v2432_v23 }
  0xe2   : > { %v2430_v12 = vadd.f32 %v935_v3, %v2224_v52  ;;  %v527_v15 = vpop.permute.xlu0 %526  ;;  %v612_v1 = vpop.permute.xlu1 %611 }
  0xe3   : > { %v999_v24 = vadd.f32 %v998_v0, %v527_v15  ;;  %v1131_v0 = vmax.f32 %v990_v43, 0.0  ;;  %v2453_v3 = vpop.permute.xlu2 %606 }
  0xe4   : > { %1548 = vmatmul.msk.f32.gmra.mxu0 %vm704_vm0, %v279_v53 }
  0xe5   : > { %v1134_v39 = vmax.f32 %v999_v24, 0.0 }
  0xe7   : > { %1294 = vmatpush.msrb.mxu2 %v1134_v39 }
  0xe8   : > { %v2437_v50 = vpop.f32.mrf.mxu2  ;;  %v2445_v34 = vpop.f32.mrf.mxu3 }
  0xe9   : > { %v2439_v52 = vpop.f32.mrf.mxu0  ;;  %1295 = vmatpush.msrb.mxu2 %v1133_v13  ;;  %2773 = vst [vmem:[#allocation25_spill] sm:$0xff] %v2445_v34 }
  0xea   : > { %v2455_v53 = vpop.permute.xlu0 %601  ;;  %v2461_v36 = vpop.permute.xlu1 %701 }
  0xeb   : > { %1296 = vmatpush.msrb.mxu2 %v1132_v51  ;;  %v2465_v43 = vpop.permute.xlu2 %596 }
  0xec   : > { %1549 = vmatmul.msk.f32.gmra.mxu0 %vm704_vm0, %v280_v49 }
  0xed   : > { %1297 = vmatpush.msrb.mxu2 %v1131_v0 }
  0xf0   : > { %v2447_v21 = vpop.f32.mrf.mxu2  ;;  %v2449_v16 = vpop.f32.mrf.mxu3 }
  0xf1   : > { %v941_v60 = vpop.f32.mrf.mxu0  ;;  %2774 = vst [vmem:[#allocation26_spill] sm:$0xff] %v2449_v16 }
  0xf2   : > { %v2467_v51 = vpop.permute.xlu0 %696  ;;  %v2471_v0 = vpop.permute.xlu1 %591 }
  0xf3   : > { %v2473_v32 = vpop.permute.xlu2 %691 }
  0xf8   : > { %v2451_v42 = vpop.f32.mrf.mxu2  ;;  %v2459_v22 = vpop.f32.mrf.mxu3 }
  0xf9   : > { %v944_v58 = vpop.f32.mrf.mxu0  ;;  %2775 = vst [vmem:[#allocation27_spill] sm:$0xff] %v2459_v22 }
  0xfa   : > { %v2475_v31 = vpop.permute.xlu0 %586  ;;  %v2479_v47 = vpop.permute.xlu1 %686 }
  0xfb   : > { %v2481_v54 = vpop.permute.xlu2 %581 }
 0x100   : > { %v2457_v15 = vpop.f32.mrf.mxu2  ;;  %v2469_v49 = vpop.f32.mrf.mxu3 }
 0x101   : > { %v947_v24 = vpop.f32.mrf.mxu0  ;;  %2776 = vst [vmem:[#allocation28_spill] sm:$0xff] %v2469_v49 }
 0x102   : > { %v2483_v14 = vpop.permute.xlu0 %681  ;;  %v2487_v9 = vpop.permute.xlu1 %576  ;;  %v948_v49 = vadd.f32 %v947_v24, %v2246_v59  ;;  %v939_v59 = vadd.f32 %v2439_v52, %v2211_v48  ;;  %v930_v48 = vadd.f32 %v2404_v11, %v2182_v38  ;;  %v1113_v52 = vmax.f32 %v2430_v12, 0.0 }
 0x103   : > { %2778 = vst [vmem:[#allocation30_spill] sm:$0xff] %v2483_v14  ;;  %v2493_v40 = vpop.permute.xlu2 %676 }
 0x108   : > { %v2463_v39 = vpop.f32.mrf.mxu2  ;;  %v2477_v37 = vpop.f32.mrf.mxu3 }
 0x109   : > { %v950_v13 = vpop.f32.mrf.mxu0  ;;  %2777 = vst [vmem:[#allocation29_spill] sm:$0xff] %v2477_v37  ;;  %v1041_v38 = vadd.f32 %v2463_v39, %v2465_v43 }
 0x10a   : > { %v951_v25 = vadd.f32 %v950_v13, %v2282_v8  ;;  %v2496_v55 = vpop.permute.xlu0 %571  ;;  %v942_v8 = vadd.f32 %v941_v60, %v2253_v62  ;;  %v1114_v62 = vmax.f32 %v939_v59, 0.0 }
 0x110   : > { %v1043_v18 = vpop.f32.mrf.mxu2  ;;  %v2485_v27 = vpop.f32.mrf.mxu3 }
 0x111   : > { %v953_v20 = vpop.f32.mrf.mxu0 }
 0x112   : > { %v954_v34 = vadd.f32 %v953_v20, %v2280_v7  ;;  %v945_v7 = vadd.f32 %v944_v58, %v2251_v61  ;;  %v1117_v20 = vmax.f32 %v948_v49, 0.0  ;;  %v1111_v49 = vmax.f32 %v930_v48, 0.0 }
 0x114   : > { %v1119_v37 = vmax.f32 %v954_v34, 0.0  ;;  %v2508_v34 = vpop.permute.xlu2 %566 }
 0x118   : > { %v1046_v46 = vpop.f32.mrf.mxu2  ;;  %v2498_v6 = vpop.f32.mrf.mxu3 }
 0x119   : > { %v956_v63 = vpop.f32.mrf.mxu0  ;;  %v1047_v24 = vadd.f32 %v1046_v46, %v2453_v3  ;;  %v1035_v3 = vadd.f32 %v2451_v42, %v2475_v31 }
 0x11a   : > { %v957_v29 = vadd.f32 %v956_v63, %v2273_v4  ;;  %v1116_v63 = vmax.f32 %v945_v7, 0.0  ;;  %v915_v7 = vadd.f32 %v2275_v5, %v2174_v35 }
 0x11b   : > { %v1150_v11 = vmax.f32 %v1047_v24, 0.0  ;;  %v1146_v42 = vmax.f32 %v1035_v3, 0.0  ;;  %v2784_v24 = vld [vmem:[#allocation13_spill] sm:$0xff] }
 0x11c   : > { %v1120_v22 = vmax.f32 %v957_v29, 0.0  ;;  %v1115_v29 = vmax.f32 %v942_v8, 0.0 }
 0x120   : > { %v1049_v41 = vpop.f32.mrf.mxu2  ;;  %v1100_v58 = vpop.f32.mrf.mxu3 }
 0x121   : > { %v959_v56 = vpop.f32.mrf.mxu0  ;;  %v1050_v60 = vadd.f32 %v1049_v41, %v612_v1  ;;  %v1044_v41 = vadd.f32 %v1043_v18, %v2455_v53  ;;  %v1109_v18 = vmax.f32 %v2361_v45, 0.0  ;;  %v1148_v53 = vmax.f32 %v1041_v38, 0.0 }
 0x122   : > { %v960_v23 = vadd.f32 %v959_v56, %v2309_v19  ;;  %v1118_v19 = vmax.f32 %v951_v25, 0.0  ;;  %v2504_v56 = vpop.permute.xlu1 %671  ;;  %v1107_v45 = vmax.f32 %v2305_v17, 0.0  ;;  %v1101_v5 = vadd.f32 %v1100_v58, %v2467_v51  ;;  %v1170_v17 = vld [vmem:[%s2748_s3] sm:$0xff] }
 0x123   : > { %v1151_v1 = vmax.f32 %v1050_v60, 0.0 }
 0x124   : > { %v1121_v16 = vmax.f32 %v960_v23, 0.0 }
 0x126   : > { %1250 = vmatpush.msrb.mxu1 %v1121_v16 }
 0x128   : > { %v1052_v14 = vpop.f32.mrf.mxu2  ;;  %1251 = vmatpush.msrb.mxu1 %v1120_v22  ;;  %v1103_v43 = vpop.f32.mrf.mxu3 }
 0x129   : > { %v2500_v4 = vpop.f32.mrf.mxu0  ;;  %v1053_v16 = vadd.f32 %v1052_v14, %v617_v10  ;;  %v1112_v10 = vmax.f32 %v2419_v33, 0.0  ;;  %v1149_v33 = vmax.f32 %v1044_v41, 0.0  ;;  %v1104_v31 = vadd.f32 %v1103_v43, %v2461_v36 }
 0x12a   : > { %1252 = vmatpush.msrb.mxu1 %v1119_v37  ;;  %v2513_v37 = vpop.permute.xlu0 %666  ;;  %v562_v13 = vpop.permute.xlu1 %561  ;;  %v1098_v36 = vadd.f32 %v2498_v6, %v2473_v32  ;;  %v2780_v32 = vld [vmem:[#allocation30_spill] sm:$0xff]  ;;  %v2781_v6 = vld [vmem:[#allocation29_spill] sm:$0xff] }
 0x12b   : > { %v1152_v14 = vmax.f32 %v1053_v16, 0.0 }
 0x12c   : > { %1253 = vmatpush.msrb.mxu1 %v1118_v19  ;;  %v1108_v19 = vmax.f32 %v2333_v30, 0.0  ;;  %v1106_v30 = vmax.f32 %v915_v7, 0.0 }
 0x12e   : > { %1254 = vmatpush.msrb.mxu1 %v1117_v20  ;;  %v1029_v20 = vadd.f32 %v2437_v50, %v2487_v9  ;;  %v1169_v9 = vmax.f32 %v1104_v31, 0.0  ;;  %v1023_v50 = vadd.f32 %v2411_v28, %v2508_v34  ;;  %v2782_v34 = vld [vmem:[#allocation18_spill] sm:$0xff] }
 0x130   : > { %v1055_v23 = vpop.f32.mrf.mxu2  ;;  %1255 = vmatpush.msrb.mxu1 %v1116_v63  ;;  %v1144_v59 = vmax.f32 %v1029_v20, 0.0  ;;  %v1095_v63 = vadd.f32 %v2485_v27, %v2479_v47  ;;  %v1142_v28 = vmax.f32 %v1023_v50, 0.0  ;;  %v2783_v27 = vld [vmem:[#allocation28_spill] sm:$0xff] }
 0x131   : > { %v1056_v61 = vadd.f32 %v1055_v23, %v2421_v44  ;;  %v2511_v25 = vpop.f32.mrf.mxu0  ;;  %v927_v44 = vadd.f32 %v2383_v57, %v2146_v26  ;;  %v2527_v26 = vpop.permute.xlu2 %661  ;;  %v1038_v57 = vadd.f32 %v2457_v15, %v2471_v0  ;;  %v1032_v15 = vadd.f32 %v2447_v21, %v2481_v54 }
 0x132   : > { %1256 = vmatpush.msrb.mxu1 %v1115_v29  ;;  %v557_v39 = vpop.permute.xlu0 %556  ;;  %v2540_v8 = vpop.permute.xlu1 %656  ;;  %v1026_v21 = vadd.f32 %v2424_v2, %v2496_v55  ;;  %v1168_v29 = vmax.f32 %v1101_v5, 0.0  ;;  %v2779_v55 = vld [vmem:[#allocation21_spill] sm:$0xff]  ;;  %v1089_v47 = vadd.f32 %v2783_v27, %v2493_v40 }
 0x133   : > { %v1153_v22 = vmax.f32 %v1056_v61, 0.0  ;;  %v1110_v12 = vmax.f32 %v927_v44, 0.0  ;;  %v1147_v0 = vmax.f32 %v1038_v57, 0.0  ;;  %v1145_v54 = vmax.f32 %v1032_v15, 0.0  ;;  %v2796_v27 = vld [vmem:[#allocation17_spill] sm:$0xff] }
 0x134   : > { %1257 = vmatpush.msrb.mxu1 %v1114_v62  ;;  %v1143_v23 = vmax.f32 %v1026_v21, 0.0  ;;  %v1020_v2 = vadd.f32 %v2779_v55, %v562_v13  ;;  %v1092_v61 = vadd.f32 %v2781_v6, %v2780_v32  ;;  %v1167_v62 = vmax.f32 %v1098_v36, 0.0  ;;  %v2785_v13 = vld [vmem:[#allocation27_spill] sm:$0xff] }
 0x135   : > { %1332 = vmatpush.msrb.mxu3 %v1153_v22  ;;  %v1017_v60 = vadd.f32 %v2782_v34, %v557_v39  ;;  %v1166_v22 = vmax.f32 %v1095_v63, 0.0  ;;  %v1086_v41 = vadd.f32 %v2785_v13, %v2504_v56  ;;  %v1164_v40 = vmax.f32 %v1089_v47, 0.0  ;;  %v2794_v63 = vld [vmem:[#allocation9_spill] sm:$0xff]  ;;  %v1172_v32 = vld [vmem:[%s2748_s3 + $0x10] sm:$0xff] }
 0x136   : > { %1258 = vmatpush.msrb.mxu1 %v1113_v52  ;;  %v1174_v52 = vld [vmem:[%s2748_s3 + $0x20] sm:$0xff]  ;;  %v1141_v44 = vmax.f32 %v1020_v2, 0.0  ;;  %v1176_v34 = vld [vmem:[%s2748_s3 + $0x30] sm:$0xff] }
 0x137   : > { %1333 = vmatpush.msrb.mxu3 %v1152_v14  ;;  %v2795_v2 = vld [vmem:[#allocation5_spill] sm:$0xff] }
 0x138   : > { %1259 = vmatpush.msrb.mxu1 %v1112_v10  ;;  %v1165_v10 = vmax.f32 %v1092_v61, 0.0 }
 0x139   : > { %1334 = vmatpush.msrb.mxu3 %v1151_v1  ;;  %v2525_v46 = vpop.f32.mrf.mxu0  ;;  %v552_v51 = vpop.permute.xlu2 %551  ;;  %v1140_v1 = vmax.f32 %v1017_v60, 0.0 }
 0x13a   : > { %1260 = vmatpush.msrb.mxu1 %v1111_v49  ;;  %v652_v16 = vpop.permute.xlu0 %651  ;;  %v547_v48 = vpop.permute.xlu1 %546  ;;  %v1014_v14 = vadd.f32 %v2784_v24, %v552_v51  ;;  %v2786_v49 = vld [vmem:[#allocation8_spill] sm:$0xff]  ;;  %v1182_v51 = vld [vmem:[%s2748_s3 + $0x60] sm:$0xff]  ;;  %v2798_v24 = vld [vmem:[#allocation15_spill] sm:$0xff] }
 0x13b   : > { %1335 = vmatpush.msrb.mxu3 %v1150_v11  ;;  %v1011_v38 = vadd.f32 %v2786_v49, %v547_v48  ;;  %v2787_v11 = vld [vmem:[#allocation26_spill] sm:$0xff]  ;;  %v2800_v49 = vld [vmem:[#allocation12_spill] sm:$0xff] }
 0x13c   : > { %1261 = vmatpush.msrb.mxu1 %v1110_v12  ;;  %v1083_v12 = vadd.f32 %v2787_v11, %v2513_v37  ;;  %v1139_v57 = vmax.f32 %v1014_v14, 0.0  ;;  %v1178_v37 = vld [vmem:[%s2748_s3 + $0x40] sm:$0xff]  ;;  %v2801_v11 = vld [vmem:[#allocation10_spill] sm:$0xff] }
 0x13d   : > { %1336 = vmatpush.msrb.mxu3 %v1149_v33  ;;  %v1138_v56 = vmax.f32 %v1011_v38, 0.0 }
 0x13e   : > { %1262 = vmatpush.msrb.mxu1 %v1109_v18  ;;  %v2788_v18 = vld [vmem:[#allocation25_spill] sm:$0xff]  ;;  %v1162_v7 = vmax.f32 %v1083_v12, 0.0 }
 0x13f   : > { %1337 = vmatpush.msrb.mxu3 %v1148_v53  ;;  %v1080_v3 = vadd.f32 %v2788_v18, %v2527_v26  ;;  %v1163_v53 = vmax.f32 %v1086_v41, 0.0  ;;  %v2791_v26 = vld [vmem:[#allocation22_spill] sm:$0xff]  ;;  %v2802_v18 = vld [vmem:[#allocation11_spill] sm:$0xff] }
 0x140   : > { %1263 = vmatpush.msrb.mxu1 %v1108_v19  ;;  %v2789_v19 = vld [vmem:[#allocation24_spill] sm:$0xff] }
 0x141   : > { %1338 = vmatpush.msrb.mxu3 %v1147_v0  ;;  %v2545_v35 = vpop.f32.mrf.mxu0  ;;  %v647_v33 = vpop.permute.xlu2 %646  ;;  %v1077_v15 = vadd.f32 %v2789_v19, %v2540_v8  ;;  %v1161_v0 = vmax.f32 %v1080_v3, 0.0  ;;  %v969_v3 = vadd.f32 %v2525_v46, %v2802_v18  ;;  %v1198_v46 = vld [vmem:[%s2748_s3 + $0xe0] sm:$0xff] }
 0x142   : > { %1264 = vmatpush.msrb.mxu1 %v1107_v45  ;;  %v642_v39 = vpop.permute.xlu0 %641  ;;  %v2790_v45 = vld [vmem:[#allocation23_spill] sm:$0xff]  ;;  %v637_v5 = vpop.permute.xlu1 %636  ;;  %v972_v12 = vadd.f32 %v2545_v35, %v2801_v11 }
 0x143   : > { %1339 = vmatpush.msrb.mxu3 %v1146_v42  ;;  %v1074_v31 = vadd.f32 %v2790_v45, %v652_v16  ;;  %v1071_v42 = vadd.f32 %v2791_v26, %v647_v33  ;;  %v1160_v20 = vmax.f32 %v1077_v15, 0.0  ;;  %v1194_v33 = vld [vmem:[%s2748_s3 + $0xc0] sm:$0xff]  ;;  %v1184_v35 = vld [vmem:[%s2748_s3 + $0x70] sm:$0xff]  ;;  %v1124_v19 = vmax.f32 %v969_v3, 0.0  ;;  %v1175_v45 = vld [vmem:[%s2748_s3 + $0x28] sm:$0xff] }
 0x144   : > { %1265 = vmatpush.msrb.mxu1 %v1106_v30  ;;  %v1177_v26 = vld [vmem:[%s2748_s3 + $0x38] sm:$0xff] }
 0x145   : > { %1340 = vmatpush.msrb.mxu3 %v1145_v54  ;;  %1266 = vmatmul.f32.vlgmr.msrb.gmra.mxu1 %v1170_v17  ;;  %v1159_v30 = vmax.f32 %v1074_v31, 0.0  ;;  %v2792_v17 = vld [vmem:[#allocation19_spill] sm:$0xff]  ;;  %v1158_v36 = vmax.f32 %v1071_v42, 0.0  ;;  %v1179_v42 = vld [vmem:[%s2748_s3 + $0x48] sm:$0xff] }
 0x146   : > { %1373 = vmatpush.msra.mxu1 %v1169_v9  ;;  %v1068_v54 = vadd.f32 %v2792_v17, %v642_v39  ;;  %v2793_v9 = vld [vmem:[#allocation14_spill] sm:$0xff]  ;;  %v1125_v39 = vmax.f32 %v972_v12, 0.0  ;;  %v1192_v31 = vld [vmem:[%s2748_s3 + $0xb0] sm:$0xff] }
 0x147   : > { %1341 = vmatpush.msrb.mxu3 %v1144_v59  ;;  %v1065_v50 = vadd.f32 %v2793_v9, %v637_v5  ;;  %v1181_v5 = vld [vmem:[%s2748_s3 + $0x58] sm:$0xff]  ;;  %v1200_v17 = vld [vmem:[%s2748_s3 + $0xf0] sm:$0xff] }
 0x148   : > { %1374 = vmatpush.msra.mxu1 %v1168_v29  ;;  %v1193_v9 = vld [vmem:[%s2748_s3 + $0xb8] sm:$0xff] }
 0x149   : > { %1342 = vmatpush.msrb.mxu3 %v1143_v23  ;;  %v2563_v58 = vpop.f32.mrf.mxu0  ;;  %v632_v8 = vpop.permute.xlu2 %631  ;;  %v1157_v23 = vmax.f32 %v1068_v54, 0.0  ;;  %v1156_v55 = vmax.f32 %v1065_v50, 0.0  ;;  %v1185_v54 = vld [vmem:[%s2748_s3 + $0x78] sm:$0xff]  ;;  %v1195_v50 = vld [vmem:[%s2748_s3 + $0xc8] sm:$0xff] }
 0x14a   : > { %1375 = vmatpush.msra.mxu1 %v1167_v62  ;;  %v627_v59 = vpop.permute.xlu0 %626  ;;  %v1062_v29 = vadd.f32 %v2794_v63, %v632_v8  ;;  %v975_v38 = vadd.f32 %v2563_v58, %v2800_v49  ;;  %v1187_v8 = vld [vmem:[%s2748_s3 + $0x88] sm:$0xff]  ;;  %v1201_v63 = vld [vmem:[%s2748_s3 + $0xf8] sm:$0xff] }
 0x14b   : > { %1343 = vmatpush.msrb.mxu3 %v1142_v28  ;;  %v1059_v16 = vadd.f32 %v2795_v2, %v627_v59  ;;  %v1186_v28 = vld [vmem:[%s2748_s3 + $0x80] sm:$0xff]  ;;  %v1199_v59 = vld [vmem:[%s2748_s3 + $0xe8] sm:$0xff] }
 0x14c   : > { %1376 = vmatpush.msra.mxu1 %v1166_v22  ;;  %v1155_v6 = vmax.f32 %v1062_v29, 0.0  ;;  %v2797_v22 = vld [vmem:[#allocation20_spill] sm:$0xff] }
 0x14d   : > { %1344 = vmatpush.msrb.mxu3 %v1141_v44  ;;  %1269 = vmatmul.f32.gmra.mxu1 %v1174_v52  ;;  %v1154_v62 = vmax.f32 %v1059_v16, 0.0  ;;  %v1190_v52 = vld [vmem:[%s2748_s3 + $0xa0] sm:$0xff] }
 0x14e   : > { %1377 = vmatpush.msra.mxu1 %v1165_v10  ;;  %v2799_v10 = vld [vmem:[#allocation16_spill] sm:$0xff] }
 0x14f   : > { %1345 = vmatpush.msrb.mxu3 %v1140_v1  ;;  %v1180_v1 = vld [vmem:[%s2748_s3 + $0x50] sm:$0xff] }
 0x150   : > { %1378 = vmatpush.msra.mxu1 %v1164_v40 }
 0x151   : > { %1346 = vmatpush.msrb.mxu3 %v1139_v57  ;;  %v977_v43 = vpop.f32.mrf.mxu0 }
 0x152   : > { %1379 = vmatpush.msra.mxu1 %v1163_v53  ;;  %v978_v13 = vadd.f32 %v977_v43, %v2799_v10  ;;  %v1126_v53 = vmax.f32 %v975_v38, 0.0  ;;  %v2804_v43 = vld [vmem:[#allocation6_spill] sm:$0xff]  ;;  %v1223_v38 = vpop.permute.xlu0 %1222 }
 0x153   : > { %1347 = vmatpush.msrb.mxu3 %v1138_v56  ;;  %v2803_v56 = vld [vmem:[#allocation7_spill] sm:$0xff] }
 0x154   : > { %1380 = vmatpush.msra.mxu1 %v1162_v7  ;;  %1348 = vmatmul.f32.vlgmr.msrb.gmra.mxu3 %v1172_v32  ;;  %v1127_v57 = vmax.f32 %v978_v13, 0.0  ;;  %v966_v58 = vadd.f32 %v2511_v25, %v2803_v56  ;;  %v963_v7 = vadd.f32 %v2500_v4, %v2804_v43  ;;  %v1171_v25 = vld [vmem:[%s2748_s3 + $0x8] sm:$0xff]  ;;  %v1188_v4 = vld [vmem:[%s2748_s3 + $0x90] sm:$0xff] }
 0x155   : > { %1272 = vmatmul.f32.gmra.mxu1 %v1178_v37 }
 0x156   : > { %1381 = vmatpush.msra.mxu1 %v1161_v0  ;;  %v1123_v15 = vmax.f32 %v966_v58, 0.0  ;;  %v1122_v37 = vmax.f32 %v963_v7, 0.0  ;;  %v1173_v0 = vld [vmem:[%s2748_s3 + $0x18] sm:$0xff] }
 0x158   : > { %1382 = vmatpush.msra.mxu1 %v1160_v20  ;;  %v1196_v20 = vld [vmem:[%s2748_s3 + $0xd0] sm:$0xff] }
 0x159   : > { %v980_v21 = vpop.f32.mrf.mxu0 }
 0x15a   : > { %1383 = vmatpush.msra.mxu1 %v1159_v30  ;;  %v981_v14 = vadd.f32 %v980_v21, %v2798_v24  ;;  %v1183_v30 = vld [vmem:[%s2748_s3 + $0x68] sm:$0xff]  ;;  %v1189_v21 = vld [vmem:[%s2748_s3 + $0x98] sm:$0xff] }
 0x15c   : > { %1384 = vmatpush.msra.mxu1 %v1158_v36  ;;  %1351 = vmatmul.f32.gmra.mxu3 %v1176_v34  ;;  %v1128_v40 = vmax.f32 %v981_v14, 0.0  ;;  %v1191_v36 = vld [vmem:[%s2748_s3 + $0xa8] sm:$0xff]  ;;  %v1213_v34 = vpop.permute.xlu1 %1212  ;;  %v1218_v14 = vpop.permute.xlu2 %1217 }
 0x15d   : > { %1275 = vmatmul.f32.gmra.mxu1 %v1182_v51  ;;  %v1197_v51 = vld [vmem:[%s2748_s3 + $0xd8] sm:$0xff] }
 0x15e   : > { %1385 = vmatpush.msra.mxu1 %v1157_v23 }
 0x160   : > { %1386 = vmatpush.msra.mxu1 %v1156_v55 }
 0x161   : > { %v983_v61 = vpop.f32.mrf.mxu0 }
 0x162   : > { %1387 = vmatpush.msra.mxu1 %v1155_v6  ;;  %v984_v47 = vadd.f32 %v983_v61, %v2796_v27 }
 0x164   : > { %1388 = vmatpush.msra.mxu1 %v1154_v62  ;;  %v1129_v41 = vmax.f32 %v984_v47, 0.0  ;;  %1354 = vmatmul.f32.gmra.mxu3 %v1180_v1 }
 0x165   : > { %1278 = vmatmul.f32.gmra.mxu1 %v1186_v28 }
 0x169   : > { %v986_v60 = vpop.f32.mrf.mxu0 }
 0x16a   : > { %v987_v48 = vadd.f32 %v986_v60, %v2797_v22 }
 0x16c   : > { %v1130_v44 = vmax.f32 %v987_v48, 0.0  ;;  %1357 = vmatmul.f32.gmra.mxu3 %v1184_v35 }
 0x16d   : > { %1281 = vmatmul.f32.gmra.mxu1 %v1190_v52 }
 0x16e   : > { %1298 = vmatpush.msrb.mxu2 %v1130_v44 }
 0x170   : > { %1299 = vmatpush.msrb.mxu2 %v1129_v41 }
 0x172   : > { %1300 = vmatpush.msrb.mxu2 %v1128_v40 }
 0x174   : > { %1301 = vmatpush.msrb.mxu2 %v1127_v57  ;;  %1360 = vmatmul.f32.gmra.mxu3 %v1188_v4 }
 0x175   : > { %1284 = vmatmul.f32.gmra.mxu1 %v1194_v33 }
 0x176   : > { %1302 = vmatpush.msrb.mxu2 %v1126_v53  ;;  %v1228_v53 = vpop.permute.xlu1 %1227 }
 0x178   : > { %1303 = vmatpush.msrb.mxu2 %v1125_v39 }
 0x17a   : > { %1304 = vmatpush.msrb.mxu2 %v1124_v19 }
 0x17c   : > { %1305 = vmatpush.msrb.mxu2 %v1123_v15  ;;  %1363 = vmatmul.f32.gmra.mxu3 %v1192_v31  ;;  %v1233_v15 = vpop.permute.xlu2 %1232 }
 0x17d   : > { %1287 = vmatmul.f32.gmra.mxu1 %v1198_v46 }
 0x17e   : > { %1306 = vmatpush.msrb.mxu2 %v1122_v37 }
 0x17f   : > { %1307 = vmatmul.f32.vlgmr.msrb.gmra.mxu2 %v1171_v25 }
 0x184   : > { %1366 = vmatmul.f32.gmra.mxu3 %v1196_v20 }
 0x185   : > { %1389 = vmatmul.f32.vlgmr.msra.gmra.mxu1 %v1173_v0 }
 0x187   : > { %1310 = vmatmul.f32.gmra.mxu2 %v1175_v45 }
 0x18c   : > { %1369 = vmatmul.f32.gmra.mxu3 %v1200_v17 }
 0x18d   : > { %1392 = vmatmul.f32.gmra.mxu1 %v1177_v26  ;;  %v1238_v26 = vpop.permute.xlu0 %1237 }
 0x18f   : > { %1313 = vmatmul.f32.gmra.mxu2 %v1179_v42 }
 0x195   : > { %1395 = vmatmul.f32.gmra.mxu1 %v1181_v5 }
 0x197   : > { %1316 = vmatmul.f32.gmra.mxu2 %v1183_v30 }
 0x19d   : > { %1398 = vmatmul.f32.gmra.mxu1 %v1185_v54 }
 0x19f   : > { %1319 = vmatmul.f32.gmra.mxu2 %v1187_v8  ;;  %v1243_v8 = vpop.permute.xlu1 %1242 }
 0x1a5   : > { %1401 = vmatmul.f32.gmra.mxu1 %v1189_v21 }
 0x1a7   : > { %1322 = vmatmul.f32.gmra.mxu2 %v1191_v36 }
 0x1ad   : > { %1404 = vmatmul.f32.gmra.mxu1 %v1193_v9 }
 0x1af   : > { %1325 = vmatmul.f32.gmra.mxu2 %v1195_v50 }
 0x1b5   : > { %1407 = vmatmul.f32.gmra.mxu1 %v1197_v51 }
 0x1b7   : > { %1328 = vmatmul.f32.gmra.mxu2 %v1199_v59 }
 0x1bd   : > { %1410 = vmatmul.f32.gmra.mxu1 %v1201_v63 }
 0x1c2   : > { %v1267_v29 = vpop.f32.mrf.mxu1 }
 0x1c3   : > { %v1268_v60 = vadd.f32 %v1267_v29, %v1213_v34  ;;  %v1248_v29 = vpop.permute.xlu2 %1247 }
 0x1ca   : > { %v1270_v23 = vpop.f32.mrf.mxu1 }
 0x1cb   : > { %v1271_v44 = vadd.f32 %v1270_v23, %v1218_v14 }
 0x1d2   : > { %v1273_v55 = vpop.f32.mrf.mxu1 }
 0x1d3   : > { %v1274_v40 = vadd.f32 %v1273_v55, %v1223_v38 }
 0x1d7   : > { %v1349_v61 = vpop.f32.mrf.mxu3 }
 0x1da   : > { %v1276_v2 = vpop.f32.mrf.mxu1 }
 0x1db   : > { %v1277_v56 = vadd.f32 %v1276_v2, %v1228_v53 }
 0x1df   : > { %v1352_v28 = vpop.f32.mrf.mxu3 }
 0x1e2   : > { %v1279_v16 = vpop.f32.mrf.mxu1 }
 0x1e3   : > { %v1280_v46 = vadd.f32 %v1279_v16, %v1233_v15 }
 0x1e7   : > { %v1355_v24 = vpop.f32.mrf.mxu3 }
 0x1ea   : > { %v1282_v32 = vpop.f32.mrf.mxu1 }
 0x1eb   : > { %v1283_v42 = vadd.f32 %v1282_v32, %v1238_v26 }
 0x1ef   : > { %v1358_v11 = vpop.f32.mrf.mxu3 }
 0x1f2   : > { %v1285_v6 = vpop.f32.mrf.mxu1 }
 0x1f3   : > { %v1286_v36 = vadd.f32 %v1285_v6, %v1243_v8 }
 0x1f7   : > { %v1361_v43 = vpop.f32.mrf.mxu3 }
 0x1fa   : > { %v2690_v62 = vpop.f32.mrf.mxu1 }
 0x1fb   : > { %v1289_v23 = vadd.f32 %v2690_v62, %v1248_v29 }
 0x1ff   : > { %v1364_v45 = vpop.f32.mrf.mxu3 }
 0x202   : > { %v1308_v27 = vpop.f32.mrf.mxu2  ;;  %v1390_v47 = vpop.f32.mrf.mxu1 }
 0x203   : > { %v1309_v22 = vadd.f32 %v1308_v27, %v1268_v60 }
 0x205   : > { %v1350_v48 = vadd.f32 %v1349_v61, %v1309_v22 }
 0x207   : > { %v1391_v52 = vadd.f32 %v1390_v47, %v1350_v48  ;;  %v1367_v21 = vpop.f32.mrf.mxu3 }
 0x209   : > { %1414 = vst [vmem:[%s2695_s29] sm:$0xff] %v1391_v52 }
 0x20a   : > { %v1311_v10 = vpop.f32.mrf.mxu2  ;;  %v1393_v13 = vpop.f32.mrf.mxu1 }
 0x20b   : > { %v1312_v41 = vadd.f32 %v1311_v10, %v1271_v44 }
 0x20d   : > { %v1353_v1 = vadd.f32 %v1352_v28, %v1312_v41 }
 0x20f   : > { %v1394_v49 = vadd.f32 %v1393_v13, %v1353_v1  ;;  %v1370_v2 = vpop.f32.mrf.mxu3 }
 0x211   : > { %1415 = vst [vmem:[%s2695_s29 + $0x8] sm:$0xff] %v1394_v49 }
 0x212   : > { %v1314_v12 = vpop.f32.mrf.mxu2  ;;  %v1396_v57 = vpop.f32.mrf.mxu1 }
 0x213   : > { %v1315_v33 = vadd.f32 %v1314_v12, %v1274_v40 }
 0x215   : > { %v1356_v18 = vadd.f32 %v1355_v24, %v1315_v33 }
 0x217   : > { %v1397_v3 = vadd.f32 %v1396_v57, %v1356_v18 }
 0x219   : > { %1416 = vst [vmem:[%s2695_s29 + $0x10] sm:$0xff] %v1397_v3 }
 0x21a   : > { %v1317_v58 = vpop.f32.mrf.mxu2  ;;  %v1399_v39 = vpop.f32.mrf.mxu1 }
 0x21b   : > { %v1318_v35 = vadd.f32 %v1317_v58, %v1277_v56 }
 0x21d   : > { %v1359_v7 = vadd.f32 %v1358_v11, %v1318_v35 }
 0x21f   : > { %v1400_v19 = vadd.f32 %v1399_v39, %v1359_v7 }
 0x221   : > { %1417 = vst [vmem:[%s2695_s29 + $0x18] sm:$0xff] %v1400_v19 }
 0x222   : > { %v1320_v37 = vpop.f32.mrf.mxu2  ;;  %v1402_v25 = vpop.f32.mrf.mxu1 }
 0x223   : > { %v1321_v4 = vadd.f32 %v1320_v37, %v1280_v46 }
 0x225   : > { %v1362_v0 = vadd.f32 %v1361_v43, %v1321_v4 }
 0x227   : > { %v1403_v31 = vadd.f32 %v1402_v25, %v1362_v0 }
 0x229   : > { %1418 = vst [vmem:[%s2695_s29 + $0x20] sm:$0xff] %v1403_v31 }
 0x22a   : > { %v1323_v20 = vpop.f32.mrf.mxu2  ;;  %v1405_v5 = vpop.f32.mrf.mxu1 }
 0x22b   : > { %v1324_v30 = vadd.f32 %v1323_v20, %v1283_v42 }
 0x22d   : > { %v1365_v17 = vadd.f32 %v1364_v45, %v1324_v30 }
 0x22f   : > { %v1406_v54 = vadd.f32 %v1405_v5, %v1365_v17 }
 0x231   : > { %1419 = vst [vmem:[%s2695_s29 + $0x28] sm:$0xff] %v1406_v54 }
 0x232   : > { %v1326_v9 = vpop.f32.mrf.mxu2  ;;  %v1408_v50 = vpop.f32.mrf.mxu1 }
 0x233   : > { %v1327_v51 = vadd.f32 %v1326_v9, %v1286_v36 }
 0x235   : > { %v1368_v59 = vadd.f32 %v1367_v21, %v1327_v51 }
 0x237   : > { %v1409_v63 = vadd.f32 %v1408_v50, %v1368_v59 }
 0x239   : > { %1420 = vst [vmem:[%s2695_s29 + $0x30] sm:$0xff] %v1409_v63 }
 0x23a   : > { %v1329_v55 = vpop.f32.mrf.mxu2  ;;  %v1411_v32 = vpop.f32.mrf.mxu1 }
 0x23b   : > { %v1330_v16 = vadd.f32 %v1329_v55, %v1289_v23 }
 0x23d   : > { %v1371_v6 = vadd.f32 %v1370_v2, %v1330_v16 }
 0x23f   : > { %v1412_v61 = vadd.f32 %v1411_v32, %v1371_v6 }
 0x241   : > { %1421 = vst [vmem:[%s2695_s29 + $0x38] sm:$0xff] %v1412_v61 }
 0x242   : > { %1708 = shalt.err (!%p1705_p5)
}
 0x243   : > { %s1762_s25 = smov 128   ;;  %s1763_s29 = smov 8  }
 0x244   : > { %1620 = dma.vmem_to_hbm [thread:$0]  (%p1834_p4), %s1437_s10, 1024, %s1439_s11, %s1423_s21, %s1762_s25, %s1762_s25, %s1763_s29  }
 0x245 PF: > { %p1626_p6 = scmp.ge.s32.totalorder %s1759_s23, 2  ;;  %s1453_s17 = sand.u32 1, %s1739_s18  }
 0x246   : > { %s1454_s7 = scalar_lea.sflag [#allocation3], %s1453_s17 }
 0x247   : > { %p1623_p7 = pnand %p1626_p6, %p1841_p8 }
 0x249   : > { %p1624_p9 = pneg %p1623_p7 }
 0x24b   : > { %1734 = dma.done.wait (%p1624_p9), %s1454_s7, 1024  }
 0x24c   : > { %1736 = vsyncadd (%p1624_p9), %s1454_s7, 4294966272  ;;  %s18_s23 = sadd.s32 1, %s1759_s23   ;;  %s2805_s18 = smov %s1743_s19 }
 0x24d   : > { %p15_p10 = scmp.ge.s32.totalorder %s18_s23, 4   ;;  %s2806_s19 = smov %s1747_s20 }
 0x24e   : > { %s2807_s20 = smov %s1847_s6  ;;  %s2808_s21 = smov %s1755_s22 }
 0x24f   : > { %s2809_s22 = smov %s2811_s26  ;;  %17 = sbr.rel (!%p15_p10) target bundleno = 4 (0x4), region = 75 }
 0x254   :  { %1460 = vsyncpa [#allocation3], 1 }
 0x255   :  { %1462 = vsyncpa [#allocation3 + $0x1], 1 }

</bundles_post_ra>
